<compile_context>
chip_gen: v7x
topology: tpu7x:2x2x1
jax: 0.10.0
libtpu: 0.0.40
codegen_flags: <defaults>
</compile_context>

<pallas_src>
import functools
import math

import jax
import jax.numpy as jnp
from jax import lax
from jax.experimental import pallas as pl
from jax.experimental.pallas import tpu as pltpu

# Finite "minus infinity": avoids any inf - inf = NaN in the online softmax.
_MASK_VALUE = -1e30


# ------------------------------ tiling helpers -------------------------------
def _choose_tile(dim, target, align):
    """Largest tile <= target that divides `dim` and is a multiple of `align`;
    falls back to the full dimension (always a legal TPU block)."""
    if dim <= target:
        return dim
    t = (target // align) * align
    while t >= align:
        if dim % t == 0:
            return t
        t -= align
    return dim


def _head_group(bh, cap=4):
    """Largest divisor of bh that is <= cap (heads batched per grid step)."""
    g = min(bh, cap)
    while bh % g:
        g -= 1
    return g


# ------------------------------ tiled linear ---------------------------------
def _linear_kernel(x_ref, w_ref, b_ref, o_ref, acc_ref):
    k = pl.program_id(2)

    @pl.when(k == 0)
    def _init():
        acc_ref[...] = jnp.zeros_like(acc_ref)

    # x/w are streamed as bf16 (cast once in the wrapper, not per tile).
    acc_ref[...] += jnp.dot(x_ref[...], w_ref[...],
                            preferred_element_type=jnp.float32)

    @pl.when(k == pl.num_programs(2) - 1)
    def _store():
        # Bias (f32) added once, on the final K step only.
        o_ref[...] = (acc_ref[...] + b_ref[...]).astype(o_ref.dtype)


def linear(x2d, w, b, out_dtype=jnp.float32):
    """x2d: (M, Din) bf16, w: (Din, Dout) bf16, b: (1, Dout) f32 -> (M, Dout)."""
    m, kdim = x2d.shape
    _, n = w.shape
    tm = _choose_tile(m, 512, 16)      # bf16 sublane alignment = 16
    tn = _choose_tile(n, 256, 128)
    tk = _choose_tile(kdim, 512, 128)
    grid = (m // tm, n // tn, kdim // tk)
    return pl.pallas_call(
        _linear_kernel,
        out_shape=jax.ShapeDtypeStruct((m, n), out_dtype),
        grid=grid,
        in_specs=[
            pl.BlockSpec((tm, tk), lambda i, j, k: (i, k)),
            pl.BlockSpec((tk, tn), lambda i, j, k: (k, j)),
            pl.BlockSpec((1, tn), lambda i, j, k: (0, j)),
        ],
        out_specs=pl.BlockSpec((tm, tn), lambda i, j, k: (i, j)),
        scratch_shapes=[pltpu.VMEM((tm, tn), jnp.float32)],
        compiler_params=pltpu.CompilerParams(
            dimension_semantics=("parallel", "parallel", "arbitrary")),
    )(x2d, w, b)


# ----------------------- flash-style triplet attention -----------------------
def _flash_triplet_kernel(qc_ref, kc_ref, v_ref, o_ref, m_scr, l_scr, acc_scr):
    # qc/kc blocks: (G, tq|tkv, 2*hd) bf16 (q||q*t, k||cumsum(k*v/sqrt(hd)),
    # scale already folded in).  v block: (G, tkv, hd) bf16.  Online-softmax
    # state (running max / denom / accumulator) lives in f32 VMEM scratch.
    _, tq, _ = qc_ref.shape
    tkv = v_ref.shape[1]
    qi = pl.program_id(1)
    ki = pl.program_id(2)

    @pl.when(ki == 0)
    def _init():
        m_scr[...] = jnp.full_like(m_scr, _MASK_VALUE)
        l_scr[...] = jnp.zeros_like(l_scr)
        acc_scr[...] = jnp.zeros_like(acc_scr)

    def _update(apply_mask):
        # Single fused score matmul (contraction depth 2*hd), bf16 in / f32 acc.
        s = jnp.einsum("gqd,gkd->gqk", qc_ref[...], kc_ref[...],
                       preferred_element_type=jnp.float32)   # (G, tq, tkv)
        if apply_mask:
            # Diagonal tile: local causal mask (q_off == k_off since tq == tkv),
            # no (T,T) materialization and no global-offset arithmetic.
            rows = lax.broadcasted_iota(jnp.int32, (tq, tkv), 0)
            cols = lax.broadcasted_iota(jnp.int32, (tq, tkv), 1)
            s = jnp.where((cols > rows)[None, :, :], _MASK_VALUE, s)

        # Online softmax update.
        m_prev = m_scr[...]
        m_new = jnp.maximum(m_prev, jnp.max(s, axis=-1, keepdims=True))
        alpha = jnp.exp(m_prev - m_new)
        p = jnp.exp(s - m_new)
        l_scr[...] = alpha * l_scr[...] + jnp.sum(p, axis=-1, keepdims=True)
        acc_scr[...] = alpha * acc_scr[...] + jnp.einsum(
            "gqk,gkd->gqd", p.astype(v_ref.dtype), v_ref[...],
            preferred_element_type=jnp.float32)
        m_scr[...] = m_new

    # With tq == tkv a tile is: interior (ki < qi, unmasked), diagonal
    # (ki == qi, partially masked), or fully above the diagonal (ki > qi,
    # skipped -- and the clamped kv index_map elides its DMA as well).
    @pl.when(ki < qi)
    def _interior():
        _update(apply_mask=False)

    @pl.when(ki == qi)
    def _diagonal():
        _update(apply_mask=True)

    @pl.when(ki == pl.num_programs(2) - 1)
    def _finalize():
        o_ref[...] = (acc_scr[...] *
                      pl.reciprocal(l_scr[...], approx=True)).astype(o_ref.dtype)


def triplet_attention_core(q_cat, k_cat, v):
    """q_cat,k_cat: (BH, T, 2*HD) bf16; v: (BH, T, HD) bf16 -> (BH, T, HD) bf16."""
    bh, T, hd2 = q_cat.shape
    hd = v.shape[-1]
    G = _head_group(bh, 4)                   # heads batched per grid step
    tq = _choose_tile(T, 128, 16)            # bf16 sublane alignment = 16
    tkv = tq                                 # kernel relies on tq == tkv
    grid = (bh // G, T // tq, T // tkv)

    q_spec = pl.BlockSpec((G, tq, hd2), lambda g, qi, ki: (g, qi, 0))
    # Clamp the kv block index to the diagonal: fully-masked tiles re-fetch the
    # previous block index, so the pipeline elides their HBM copies entirely.
    k_spec = pl.BlockSpec((G, tkv, hd2),
                          lambda g, qi, ki: (g, jnp.minimum(ki, qi), 0))
    v_spec = pl.BlockSpec((G, tkv, hd),
                          lambda g, qi, ki: (g, jnp.minimum(ki, qi), 0))
    out_spec = pl.BlockSpec((G, tq, hd), lambda g, qi, ki: (g, qi, 0))

    return pl.pallas_call(
        _flash_triplet_kernel,
        out_shape=jax.ShapeDtypeStruct((bh, T, hd), jnp.bfloat16),
        grid=grid,
        in_specs=[q_spec, k_spec, v_spec],
        out_specs=out_spec,
        scratch_shapes=[
            pltpu.VMEM((G, tq, 1), jnp.float32),    # running max
            pltpu.VMEM((G, tq, 1), jnp.float32),    # running denominator
            pltpu.VMEM((G, tq, hd), jnp.float32),   # output accumulator
        ],
        compiler_params=pltpu.CompilerParams(
            dimension_semantics=("parallel", "parallel", "arbitrary")),
    )(q_cat, k_cat, v)


# ------------------------------- full forward --------------------------------
def init_params(key, d_model):
    k1, k2, k3, k4 = jax.random.split(key, 4)
    lim = 1.0 / math.sqrt(d_model)   # nn.Linear default init range
    return {
        "w_qkvt": jax.random.uniform(k1, (d_model, 4 * d_model), jnp.float32, -lim, lim),
        "b_qkvt": jax.random.uniform(k2, (1, 4 * d_model), jnp.float32, -lim, lim),
        "w_out": jax.random.uniform(k3, (d_model, d_model), jnp.float32, -lim, lim),
        "b_out": jax.random.uniform(k4, (1, d_model), jnp.float32, -lim, lim),
    }


def triplet_attention_forward(x, params, num_heads):
    B, T, D = x.shape
    H = num_heads
    HD = D // H
    scale = 1.0 / math.sqrt(HD)

    # QKVT projection: bf16 operands streamed, f32 accumulate/output.
    qkvt = linear(x.reshape(B * T, D).astype(jnp.bfloat16),
                  params["w_qkvt"].astype(jnp.bfloat16), params["b_qkvt"])
    qkvt = qkvt.reshape(B, T, 4, H, HD)
    # Single layout pass: (B,T,4,H,HD) -> (4, B*H, T, HD).
    qkvt = jnp.transpose(qkvt, (2, 0, 3, 1, 4)).reshape(4, B * H, T, HD)
    q, k, v, t = qkvt[0], qkvt[1], qkvt[2], qkvt[3]

    # True prefix sum of (k*v)/sqrt(hd), kept in f32 (it grows with T), then the
    # two score matmuls are fused into one by concatenating along the head dim:
    #   (q·k + (q*t)·trip) * scale == (scale*[q, q*t]) · [k, trip]
    # TODO(synk): fuse the prefix sum into the kernel with a carried running sum.
    trip = jnp.cumsum(k * v * scale, axis=1)
    q_cat = (jnp.concatenate([q, q * t], axis=-1) * scale).astype(jnp.bfloat16)
    k_cat = jnp.concatenate([k, trip], axis=-1).astype(jnp.bfloat16)

    attn = triplet_attention_core(q_cat, k_cat, v.astype(jnp.bfloat16))
    attn = attn.reshape(B, H, T, HD).transpose(0, 2, 1, 3).reshape(B * T, D)

    out = linear(attn, params["w_out"].astype(jnp.bfloat16), params["b_out"])
    return out.reshape(B, T, D)


# ------------------------------ pure-JAX references --------------------------
def _reference_forward(x, params, num_heads):
    """Faithful f32 re-implementation of the PyTorch module (eval mode)."""
    B, T, D = x.shape
    H = num_heads
    HD = D // H
    scale = 1.0 / math.sqrt(HD)

    qkvt = x.reshape(B * T, D) @ params["w_qkvt"] + params["b_qkvt"]
    qkvt = qkvt.reshape(B, T, 4, H, HD)
    q, k, v, t = (jnp.transpose(qkvt[:, :, i], (0, 2, 1, 3)) for i in range(4))

    scores_dot = jnp.einsum("bhqd,bhkd->bhqk", q, k)
    trip_cumsum = jnp.cumsum(k * v * scale, axis=2)
    scores_trip = jnp.einsum("bhqd,bhkd->bhqk", q * t, trip_cumsum)
    scores = (scores_dot + scores_trip) * scale

    mask = jnp.triu(jnp.ones((T, T), bool), k=1)[None, None]
    scores = jnp.where(mask, -jnp.inf, scores)
    scores = scores - jnp.max(scores, axis=-1, keepdims=True)
    w = jax.nn.softmax(scores, axis=-1)
    attn = jnp.einsum("bhqk,bhkd->bhqd", w, v)
    attn = attn.transpose(0, 2, 1, 3).reshape(B * T, D)
    out = attn @ params["w_out"] + params["b_out"]
    return out.reshape(B, T, D)


def _core_reference(q_cat, k_cat, v):
    """Dense causal softmax attention on the same bf16 inputs as the kernel."""
    qf = q_cat.astype(jnp.float32)
    kf = k_cat.astype(jnp.float32)
    vf = v.astype(jnp.float32)
    s = jnp.einsum("bqd,bkd->bqk", qf, kf)
    T = s.shape[1]
    mask = jnp.triu(jnp.ones((T, T), bool), k=1)[None]
    s = jnp.where(mask, -jnp.inf, s)
    p = jax.nn.softmax(s, axis=-1)
    p = p.astype(jnp.bfloat16).astype(jnp.float32)   # kernel casts p to bf16
    return jnp.einsum("bqk,bkd->bqd", p, vf)


if __name__ == "__main__":
    # ---- end-to-end check at a small shape (vs f32 PyTorch-style reference) --
    B, T, D, H = 2, 8, 32, 4
    key = jax.random.PRNGKey(0)
    kx, kp = jax.random.split(key)
    x = jax.random.normal(kx, (B, T, D), jnp.float32)
    params = init_params(kp, D)

    out = jax.block_until_ready(triplet_attention_forward(x, params, H))
    ref = _reference_forward(x, params, H)
    assert out.shape == (B, T, D)
    # bf16 MXU operands (f32 accumulate) vs pure-f32 reference -> loose tol.
    assert jnp.allclose(out, ref, atol=5e-2, rtol=5e-2), (
        f"max abs err {jnp.max(jnp.abs(out - ref))}")

    # ---- tiled-path check of the attention core (multi-tile online softmax,
    # ---- causal compute/DMA skip, diagonal-only masking) on bf16 inputs ------
    BH, Tc, HDc = 8, 256, 64
    ks = jax.random.split(jax.random.PRNGKey(1), 4)
    qg, kg, vg, tg = (jax.random.normal(ks[i], (BH, Tc, HDc), jnp.float32) * 0.5
                      for i in range(4))
    sc = 1.0 / math.sqrt(HDc)
    trip_g = jnp.cumsum(kg * vg * sc, axis=1)
    qc_g = (jnp.concatenate([qg, qg * tg], axis=-1) * sc).astype(jnp.bfloat16)
    kc_g = jnp.concatenate([kg, trip_g], axis=-1).astype(jnp.bfloat16)
    vb_g = vg.astype(jnp.bfloat16)

    core_out = jax.block_until_ready(
        triplet_attention_core(qc_g, kc_g, vb_g)).astype(jnp.float32)
    core_ref = _core_reference(qc_g, kc_g, vb_g)
    assert core_out.shape == (BH, Tc, HDc)
    assert jnp.allclose(core_out, core_ref, atol=2e-2, rtol=2e-2), (
        f"core max abs err {jnp.max(jnp.abs(core_out - core_ref))}")

    print("KERNEL_OK")
</pallas_src>

<mosaic_0001>
module attributes {stable_mosaic.version = 11 : i64} {
  func.func @_linear_kernel(%arg0: i32, %arg1: i32, %arg2: i32, %arg3: memref<16x32xbf16, #tpu.memory_space<vmem>>, %arg4: memref<32x128xbf16, #tpu.memory_space<vmem>>, %arg5: memref<1x128xf32, #tpu.memory_space<vmem>>, %arg6: memref<16x128xf32, #tpu.memory_space<vmem>>, %arg7: memref<16x128xf32, #tpu.memory_space<vmem>>) attributes {dimension_semantics = [#tpu.dimension_semantics<parallel>, #tpu.dimension_semantics<parallel>, #tpu.dimension_semantics<arbitrary>], iteration_bounds = array<i64: 1, 1, 1>, scalar_prefetch = 0 : i64, scratch_operands = 1 : i64, tpu.core_type = #tpu.core_type<tc>, window_params = [{transform_indices = @transform_0, window_bounds = array<i64: 16, 32>}, {transform_indices = @transform_1, window_bounds = array<i64: 32, 128>}, {transform_indices = @transform_2, window_bounds = array<i64: 1, 128>}, {transform_indices = @transform_3, window_bounds = array<i64: 16, 128>}]} {
    %c0_i32 = arith.constant 0 : i32
    %0 = arith.cmpi eq, %arg2, %c0_i32 : i32
    %1 = arith.extui %0 : i1 to i32
    %c0_i32_0 = arith.constant 0 : i32
    %2 = arith.cmpi ne, %1, %c0_i32_0 : i32
    scf.if %2 {
      %cst_10 = arith.constant 0.000000e+00 : f32
      %12 = vector.broadcast %cst_10 : f32 to vector<16x128xf32>
      %c0_11 = arith.constant 0 : index
      %c0_12 = arith.constant 0 : index
      %13 = vector.load %arg7[%c0_11, %c0_12] : memref<16x128xf32, #tpu.memory_space<vmem>>, vector<16x128xf32>
      tpu.vector_store %arg7[%c0_11, %c0_12], %12 {strides = array<i32>} : memref<16x128xf32, #tpu.memory_space<vmem>>, vector<16x128xf32>,
    } else {
    }
    %c0 = arith.constant 0 : index
    %c0_1 = arith.constant 0 : index
    %3 = vector.load %arg7[%c0, %c0_1] : memref<16x128xf32, #tpu.memory_space<vmem>>, vector<16x128xf32>
    %c0_2 = arith.constant 0 : index
    %c0_3 = arith.constant 0 : index
    %4 = vector.load %arg3[%c0_2, %c0_3] : memref<16x32xbf16, #tpu.memory_space<vmem>>, vector<16x32xbf16>
    %c0_4 = arith.constant 0 : index
    %c0_5 = arith.constant 0 : index
    %5 = vector.load %arg4[%c0_4, %c0_5] : memref<32x128xbf16, #tpu.memory_space<vmem>>, vector<32x128xbf16>
    %cst = arith.constant dense<0.000000e+00> : vector<16x128xf32>
    %6 = tpu.matmul %4, %5, %cst {dimension_numbers = #tpu.dot_dimension_numbers<[1], [0], [0], [1], [0, 0, 1, 1], [], []>} : vector<16x32xbf16>, vector<32x128xbf16>, vector<16x128xf32> -> vector<16x128xf32>
    %7 = arith.addf %3, %6 : vector<16x128xf32>
    %c0_6 = arith.constant 0 : index
    %c0_7 = arith.constant 0 : index
    %8 = vector.load %arg7[%c0_6, %c0_7] : memref<16x128xf32, #tpu.memory_space<vmem>>, vector<16x128xf32>
    tpu.vector_store %arg7[%c0_6, %c0_7], %7 {strides = array<i32>} : memref<16x128xf32, #tpu.memory_space<vmem>>, vector<16x128xf32>,
    %c0_i32_8 = arith.constant 0 : i32
    %9 = arith.cmpi eq, %arg2, %c0_i32_8 : i32
    %10 = arith.extui %9 : i1 to i32
    %c0_i32_9 = arith.constant 0 : i32
    %11 = arith.cmpi ne, %10, %c0_i32_9 : i32
    scf.if %11 {
      %c0_10 = arith.constant 0 : index
      %c0_11 = arith.constant 0 : index
      %12 = vector.load %arg7[%c0_10, %c0_11] : memref<16x128xf32, #tpu.memory_space<vmem>>, vector<16x128xf32>
      %c0_12 = arith.constant 0 : index
      %c0_13 = arith.constant 0 : index
      %13 = vector.load %arg5[%c0_12, %c0_13] : memref<1x128xf32, #tpu.memory_space<vmem>>, vector<1x128xf32>
      %14 = vector.broadcast %13 : vector<1x128xf32> to vector<16x128xf32>
      %15 = arith.addf %12, %14 : vector<16x128xf32>
      %c0_14 = arith.constant 0 : index
      %c0_15 = arith.constant 0 : index
      %16 = vector.load %arg6[%c0_14, %c0_15] : memref<16x128xf32, #tpu.memory_space<vmem>>, vector<16x128xf32>
      tpu.vector_store %arg6[%c0_14, %c0_15], %15 {strides = array<i32>} : memref<16x128xf32, #tpu.memory_space<vmem>>, vector<16x128xf32>,
    } else {
    }
    return
  }
  func.func @transform_0(%arg0: i32, %arg1: i32, %arg2: i32) -> (i32, i32) {
    %c0_i32 = arith.constant 0 : i32
    return %arg0, %arg2 : i32, i32
  }
  func.func @transform_1(%arg0: i32, %arg1: i32, %arg2: i32) -> (i32, i32) {
    %c0_i32 = arith.constant 0 : i32
    return %arg2, %arg1 : i32, i32
  }
  func.func @transform_2(%arg0: i32, %arg1: i32, %arg2: i32) -> (i32, i32) {
    %c0_i32 = arith.constant 0 : i32
    %c0_i32_0 = arith.constant 0 : i32
    return %c0_i32, %arg1 : i32, i32
  }
  func.func @transform_3(%arg0: i32, %arg1: i32, %arg2: i32) -> (i32, i32) {
    %c0_i32 = arith.constant 0 : i32
    return %arg0, %arg1 : i32, i32
  }
}

</mosaic_0001>

<bundles_post_ra>
// kernel: tpu_custom_call.1
= control target key start
LH: loop header
LB: loop body
LE: loop exit
PB: predicated region body
PF: predicated region fallthrough
CT: control target
= control target key end

     0   :  { %8 = vsyncpa [#allocation4], 0  ;;  %s326_s0 = inlined_call_operand.hbm [shape: bf16[16,32], index: 0, kind: input, shape index: {}]   ;;  %s327_s1 = inlined_call_operand.hbm [shape: bf16[32,128], index: 1, kind: input, shape index: {}]   ;;  %s328_s2 = inlined_call_operand.vmem [shape: f32[1,128], index: 2, kind: input, shape index: {}]   ;;  %s329_s3 = inlined_call_operand.hbm [shape: f32[16,128], index: 3, kind: output, shape index: {}]  }
   0x1   :  { %9 = vsyncpa [#allocation7], 0 }
   0x2   :  { %10 = vsyncpa [#allocation5], 0  ;;  %s258_s12 = smov [#allocation3]   ;;  %s186_s16 = scalar_lea.hbm %s326_s0, 128 }
   0x3   :  { %s16_s13 = sshll.u32 %s258_s12, 4  ;;  %p187_p0 = scmp.ne.s32.totalorder %s326_s0, %s186_s16  ;;  %s17_s13 = int_to_ptr.vmem [resolvable:$true] %s16_s13 }
   0x4   :  { %p190_p1 = scmp.lt.u32.totalorder %s186_s16, %s326_s0 }
   0x6   :  { %p192_p2 = pnand %p190_p1, %p187_p0 }
   0x8   :  { %195 = shalt.err (!%p192_p2)
}
   0x9   :  { %s196_s21 = scalar_lea.vmem %s17_s13, 128  ;;  %p201_p4 = scmp.lt.s32.totalorder %s17_s13, %s17_s13 }
   0xa   :  { %p197_p3 = scmp.ne.s32.totalorder %s17_s13, %s196_s21  ;;  %p202_p5 = scmp.lt.s32.totalorder %s196_s21, %s196_s21 }
   0xc   :  { %p203_p6 = por %p202_p5, %p201_p4 }
   0xe   :  { %p204_p7 = pnand %p203_p6, %p197_p3 }
  0x10   :  { %207 = shalt.err (!%p204_p7)
}
  0x11   :  { %s259_s22 = smov 64   ;;  %s260_s23 = smov 4  }
  0x12   :  { %22 = dma.hbm_to_vmem [thread:$0]  %s326_s0, 128, %s17_s13, [#allocation4], %s259_s22, %s259_s22, %s260_s23  }
  0x13   :  { %s261_s26 = smov [#allocation6]   ;;  %s208_s30 = scalar_lea.hbm %s327_s1, 256 }
  0x14   :  { %s28_s27 = sshll.u32 %s261_s26, 4  ;;  %p209_p8 = scmp.ne.s32.totalorder %s327_s1, %s208_s30  ;;  %s29_s27 = int_to_ptr.vmem [resolvable:$true] %s28_s27 }
  0x15   :  { %p212_p9 = scmp.lt.u32.totalorder %s208_s30, %s327_s1 }
  0x17   :  { %p214_p10 = pnand %p212_p9, %p209_p8 }
  0x19   :  { %217 = shalt.err (!%p214_p10)
}
  0x1a   :  { %s218_s8 = scalar_lea.vmem %s29_s27, 256  ;;  %p223_p12 = scmp.lt.s32.totalorder %s29_s27, %s29_s27 }
  0x1b   :  { %p219_p11 = scmp.ne.s32.totalorder %s29_s27, %s218_s8  ;;  %p224_p13 = scmp.lt.s32.totalorder %s218_s8, %s218_s8 }
  0x1d   :  { %p225_p0 = por %p224_p13, %p223_p12 }
  0x1f   :  { %p226_p1 = pnand %p225_p0, %p219_p11 }
  0x21   :  { %229 = shalt.err (!%p226_p1)
}
  0x22   :  { %34 = dma.hbm_to_vmem [thread:$0]  %s327_s1, 256, %s29_s27, [#allocation7], %s259_s22, %s259_s22, %s260_s23  }
  0x23   :  { %252 = dma.done.wait [#allocation4], 128  }
  0x24   :  { %253 = vsyncadd [#allocation4], 4294967168 }
  0x25   :  { %254 = dma.done.wait [#allocation7], 256  }
  0x26   :  { %255 = vsyncadd [#allocation7], 4294967040  ;;  %v262_v0 = vmov 0.0   ;;  %vm263_vm0 = vmmov 0   ;;  %v183_v1 = vld [vmem:[#allocation6] sm:$0xff]   ;;  %v184_v2 = vld [vmem:[#allocation6 + $0x8] sm:$0xff]  }
  0x27   :  { %166 = vmatprep.subr.bf16.mxu0 %v262_v0  ;;  %170 = vmatprep.mubr.msk.bf16.mxu0 %vm263_vm0, %v262_v0  ;;  %v185_v3 = vld [vmem:[#allocation3] sm:$0xff]   ;;  %vm75_vm1 = vcmask 261120   ;;  %s264_s1 = smov [#allocation8]  }
  0x28   :  { %167 = vmatpush3.bf16.msra.mxu0 %v183_v1  ;;  %v162_v4 = vld [vmem:[%s328_s2] ss:$0 sm:$0xff]  ;;  %s145_s12 = sshll.u32 %s264_s1, 4  ;;  %s146_s12 = int_to_ptr.vmem [resolvable:$true] %s145_s12 }
  0x29   :  { %168 = vmatprep.subr.bf16.mxu0 %v262_v0  ;;  %s230_s13 = scalar_lea.vmem %s146_s12, 256  ;;  %p235_p3 = scmp.lt.s32.totalorder %s146_s12, %s146_s12 }
  0x2a   :  { %p231_p2 = scmp.ne.s32.totalorder %s146_s12, %s230_s13  ;;  %p236_p4 = scmp.lt.s32.totalorder %s230_s13, %s230_s13 }
  0x2c   :  { %169 = vmatpush3.bf16.msra.mxu0 %v184_v2  ;;  %p237_p5 = por %p236_p4, %p235_p3 }
  0x2e   :  { %p238_p6 = pnand %p237_p5, %p231_p2 }
  0x2f   :  { %171 = vmatmul.mubr.msk.bf16.vlgmr.msra.gmra.mrb[0].mxu0 %vm75_vm1, %v185_v3 }
 0x102   :  { %v113_v5 = vpop.f32.mrb[0].mxu0 }
 0x103   :  { %v136_v6 = vadd.f32 %v162_v4, %v113_v5  ;;  %v172_v7 = vpop.f32.mrb[1].mxu0 }
 0x104   :  { %v116_v8 = vpop.f32.mrb[2].mxu0 }
 0x105   :  { %138 = vst [vmem:[#allocation8] sm:$0xff] %v136_v6  ;;  %v137_v9 = vadd.f32 %v162_v4, %v116_v8  ;;  %v173_v10 = vpop.f32.mrb[3].mxu0 }
 0x107   :  { %139 = vst [vmem:[#allocation8 + $0x8] sm:$0xff] %v137_v9 }
 0x108   :  { %241 = shalt.err (!%p238_p6)
}
 0x109   :  { %s242_s15 = scalar_lea.hbm %s329_s3, 256 }
 0x10a   :  { %p243_p7 = scmp.ne.s32.totalorder %s329_s3, %s242_s15  ;;  %p246_p8 = scmp.lt.u32.totalorder %s242_s15, %s329_s3 }
 0x10c   :  { %p248_p9 = pnand %p246_p8, %p243_p7 }
 0x10e   :  { %251 = shalt.err (!%p248_p9)
}
 0x10f   :  { %s265_s20 = smov 128   ;;  %s266_s21 = smov 8  }
 0x110   :  { %151 = dma.vmem_to_hbm [thread:$0]  %s146_s12, 256, %s329_s3, [#allocation5], %s265_s20, %s265_s20, %s266_s21  }
 0x111   :  { %256 = dma.done.wait [#allocation5], 256  }
 0x112   :  { %257 = vsyncadd [#allocation5], 4294967040 }
 0x113   :  { %155 = vsyncpa [#allocation4], 1 }
 0x114   :  { %156 = vsyncpa [#allocation7], 1 }
 0x115   :  { %157 = vsyncpa [#allocation5], 1 }

</bundles_post_ra>
